<compile_context>
chip_gen: v6e
topology: v6e:2x2x1
jax: 0.10.0
libtpu: 0.0.40
codegen_flags: <defaults>
</compile_context>

<pallas_src>
import functools

import jax
import jax.numpy as jnp
from jax.experimental import pallas as pl
from jax.experimental.pallas import tpu as pltpu

BN_EPS = 1e-5


def fc_block_kernel(x_ref, w_ref, gamma_ref, beta_ref, o_ref, acc_ref):
    k = pl.program_id(1)

    @pl.when(k == 0)
    def _():
        acc_ref[...] = jnp.zeros_like(acc_ref)

    # x: (N, tk), w: (tn, tk) -- both in native dtype; contract x dim 1 with w dim 1.
    # MXU takes the transposed RHS natively, so no transpose is materialized anywhere.
    acc_ref[...] += jax.lax.dot_general(
        x_ref[...], w_ref[...],
        dimension_numbers=(((1,), (1,)), ((), ())),
        preferred_element_type=jnp.float32,
    )

    @pl.when(k == pl.num_programs(1) - 1)
    def _():
        y = acc_ref[...]                             # (N, tn) f32, full Linear output tile
        gamma = gamma_ref[...].astype(jnp.float32)   # (1, tn)
        beta = beta_ref[...].astype(jnp.float32)     # (1, tn)

        # BatchNorm1d with batch statistics (biased variance).  The Linear bias would
        # cancel exactly in (y - mean), so it was never added.
        mean = jnp.mean(y, axis=0, keepdims=True)
        diff = y - mean
        var = jnp.mean(diff * diff, axis=0, keepdims=True)

        # Fold BN into one FMA per element.
        scale = gamma * jax.lax.rsqrt(var + BN_EPS)
        shift = beta - mean * scale
        z = y * scale + shift

        # SiLU
        o_ref[...] = (z * jax.nn.sigmoid(z)).astype(o_ref.dtype)


def _round_up(x, m):
    return (x + m - 1) // m * m


def _pick_tile(dim, candidates=(512, 256, 128)):
    for c in candidates:
        if dim % c == 0:
            return c
    return dim


@functools.partial(jax.jit, static_argnames=())
def fc_block(x, weight, bias, gamma, beta):
    """x: (N, in_features); weight: (out_features, in_features) as in nn.Linear.

    `bias` is accepted for API parity but is unused: under batch-statistic BatchNorm
    the bias cancels exactly in (y - mean).
    """
    del bias  # cancels exactly under batch-stat BN (training-mode BatchNorm1d)

    n, in_f = x.shape
    out_f = weight.shape[0]

    # Pad feature dims to multiples of 128 for lane-dense MXU operands / stores.
    in_p = _round_up(in_f, 128)
    out_p = _round_up(out_f, 128)
    if in_p != in_f:
        x = jnp.pad(x, ((0, 0), (0, in_p - in_f)))
        weight = jnp.pad(weight, ((0, 0), (0, in_p - in_f)))
    if out_p != out_f:
        weight = jnp.pad(weight, ((0, out_p - out_f), (0, 0)))
        gamma = jnp.pad(gamma, (0, out_p - out_f))
        beta = jnp.pad(beta, (0, out_p - out_f))

    g2 = gamma.reshape(1, out_p)
    b2 = beta.reshape(1, out_p)

    tn = _pick_tile(out_p)   # output-feature tile (lane dim, multiple of 128)
    tk = _pick_tile(in_p)    # contraction tile   (multiple of 128)
    grid = (out_p // tn, in_p // tk)

    out = pl.pallas_call(
        fc_block_kernel,
        out_shape=jax.ShapeDtypeStruct((n, out_p), x.dtype),
        grid_spec=pltpu.PrefetchScalarGridSpec(
            num_scalar_prefetch=0,
            grid=grid,
            in_specs=[
                pl.BlockSpec((n, tk), lambda j, k: (0, k)),    # x tile
                pl.BlockSpec((tn, tk), lambda j, k: (j, k)),   # weight tile (out,in layout)
                pl.BlockSpec((1, tn), lambda j, k: (0, j)),    # gamma tile
                pl.BlockSpec((1, tn), lambda j, k: (0, j)),    # beta tile
            ],
            out_specs=pl.BlockSpec((n, tn), lambda j, k: (0, j)),
            scratch_shapes=[pltpu.VMEM((n, tn), jnp.float32)],
        ),
        compiler_params=pltpu.CompilerParams(
            dimension_semantics=("parallel", "arbitrary"),
        ),
    )(x, weight, g2, b2)

    return out[:, :out_f] if out_p != out_f else out


def reference_fc_block(x, weight, bias, gamma, beta):
    y = x @ weight.T + bias
    mean = jnp.mean(y, axis=0, keepdims=True)
    var = jnp.mean((y - mean) ** 2, axis=0, keepdims=True)
    z = gamma * (y - mean) / jnp.sqrt(var + BN_EPS) + beta
    return z * jax.nn.sigmoid(z)


def _run_case(key, n, in_f, out_f):
    k_x, k_w, k_b = jax.random.split(key, 3)
    x = jax.random.normal(k_x, (n, in_f), dtype=jnp.float32)

    # nn.Linear default init: U(-1/sqrt(in), 1/sqrt(in))
    bound = 1.0 / (in_f ** 0.5)
    weight = jax.random.uniform(k_w, (out_f, in_f), minval=-bound, maxval=bound,
                                dtype=jnp.float32)
    bias = jax.random.uniform(k_b, (out_f,), minval=-bound, maxval=bound,
                              dtype=jnp.float32)
    # BatchNorm1d defaults: gamma=1, beta=0
    gamma = jnp.ones((out_f,), dtype=jnp.float32)
    beta = jnp.zeros((out_f,), dtype=jnp.float32)

    out = jax.block_until_ready(fc_block(x, weight, bias, gamma, beta))
    ref = reference_fc_block(x, weight, bias, gamma, beta)

    assert out.shape == (n, out_f)
    # Bias is dropped in the kernel (exact cancellation under batch-stat BN); allow a
    # slightly looser tolerance for the resulting floating-point reassociation.
    assert jnp.allclose(out, ref, atol=1e-4, rtol=1e-4), "mismatch vs reference"


if __name__ == "__main__":
    key = jax.random.PRNGKey(0)
    k0, k1 = jax.random.split(key)

    # Small case matching the module's typical use (needs feature padding to 128).
    _run_case(k0, n=8, in_f=32, out_f=32)
    # A case that exercises a real (j, k) grid with multiple output tiles.
    _run_case(k1, n=16, in_f=256, out_f=384)

    print("KERNEL_OK")
</pallas_src>

<mosaic_0001>
module attributes {stable_mosaic.version = 11 : i64} {
  func.func @fc_block_kernel(%arg0: i32, %arg1: i32, %arg2: memref<8x128xf32, #tpu.memory_space<vmem>>, %arg3: memref<128x128xf32, #tpu.memory_space<vmem>>, %arg4: memref<1x128xf32, #tpu.memory_space<vmem>>, %arg5: memref<1x128xf32, #tpu.memory_space<vmem>>, %arg6: memref<8x128xf32, #tpu.memory_space<vmem>>, %arg7: memref<8x128xf32, #tpu.memory_space<vmem>>) attributes {dimension_semantics = [#tpu.dimension_semantics<parallel>, #tpu.dimension_semantics<arbitrary>], iteration_bounds = array<i64: 1, 1>, scalar_prefetch = 0 : i64, scratch_operands = 1 : i64, tpu.core_type = #tpu.core_type<tc>, window_params = [{transform_indices = @transform_0, window_bounds = array<i64: 8, 128>}, {transform_indices = @transform_1, window_bounds = array<i64: 128, 128>}, {transform_indices = @transform_2, window_bounds = array<i64: 1, 128>}, {transform_indices = @transform_3, window_bounds = array<i64: 1, 128>}, {transform_indices = @transform_4, window_bounds = array<i64: 8, 128>}]} {
    %c0_i32 = arith.constant 0 : i32
    %0 = arith.cmpi eq, %arg1, %c0_i32 : i32
    %1 = arith.extui %0 : i1 to i32
    %c0_i32_0 = arith.constant 0 : i32
    %2 = arith.cmpi ne, %1, %c0_i32_0 : i32
    scf.if %2 {
      %cst_10 = arith.constant 0.000000e+00 : f32
      %12 = vector.broadcast %cst_10 : f32 to vector<8x128xf32>
      %c0_11 = arith.constant 0 : index
      %c0_12 = arith.constant 0 : index
      %13 = vector.load %arg7[%c0_11, %c0_12] : memref<8x128xf32, #tpu.memory_space<vmem>>, vector<8x128xf32>
      tpu.vector_store %arg7[%c0_11, %c0_12], %12 {strides = array<i32>} : memref<8x128xf32, #tpu.memory_space<vmem>>, vector<8x128xf32>,
    } else {
    }
    %c0 = arith.constant 0 : index
    %c0_1 = arith.constant 0 : index
    %3 = vector.load %arg7[%c0, %c0_1] : memref<8x128xf32, #tpu.memory_space<vmem>>, vector<8x128xf32>
    %c0_2 = arith.constant 0 : index
    %c0_3 = arith.constant 0 : index
    %4 = vector.load %arg2[%c0_2, %c0_3] : memref<8x128xf32, #tpu.memory_space<vmem>>, vector<8x128xf32>
    %c0_4 = arith.constant 0 : index
    %c0_5 = arith.constant 0 : index
    %5 = vector.load %arg3[%c0_4, %c0_5] : memref<128x128xf32, #tpu.memory_space<vmem>>, vector<128x128xf32>
    %cst = arith.constant dense<0.000000e+00> : vector<8x128xf32>
    %6 = tpu.matmul %4, %5, %cst {dimension_numbers = #tpu.dot_dimension_numbers<[1], [1], [0], [0], [0, 0, 1, 0], [], []>} : vector<8x128xf32>, vector<128x128xf32>, vector<8x128xf32> -> vector<8x128xf32>
    %7 = arith.addf %3, %6 : vector<8x128xf32>
    %c0_6 = arith.constant 0 : index
    %c0_7 = arith.constant 0 : index
    %8 = vector.load %arg7[%c0_6, %c0_7] : memref<8x128xf32, #tpu.memory_space<vmem>>, vector<8x128xf32>
    tpu.vector_store %arg7[%c0_6, %c0_7], %7 {strides = array<i32>} : memref<8x128xf32, #tpu.memory_space<vmem>>, vector<8x128xf32>,
    %c0_i32_8 = arith.constant 0 : i32
    %9 = arith.cmpi eq, %arg1, %c0_i32_8 : i32
    %10 = arith.extui %9 : i1 to i32
    %c0_i32_9 = arith.constant 0 : i32
    %11 = arith.cmpi ne, %10, %c0_i32_9 : i32
    scf.if %11 {
      %c0_10 = arith.constant 0 : index
      %c0_11 = arith.constant 0 : index
      %12 = vector.load %arg7[%c0_10, %c0_11] : memref<8x128xf32, #tpu.memory_space<vmem>>, vector<8x128xf32>
      %c0_12 = arith.constant 0 : index
      %c0_13 = arith.constant 0 : index
      %13 = vector.load %arg4[%c0_12, %c0_13] : memref<1x128xf32, #tpu.memory_space<vmem>>, vector<1x128xf32>
      %c0_14 = arith.constant 0 : index
      %c0_15 = arith.constant 0 : index
      %14 = vector.load %arg5[%c0_14, %c0_15] : memref<1x128xf32, #tpu.memory_space<vmem>>, vector<1x128xf32>
      %cst_16 = arith.constant dense<0.000000e+00> : vector<128xf32>
      %15 = vector.multi_reduction <add>, %12, %cst_16 [0] : vector<8x128xf32> to vector<128xf32>
      %16 = vector.shape_cast %15 : vector<128xf32> to vector<1x128xf32>
      %cst_17 = arith.constant 8.000000e+00 : f32
      %17 = vector.broadcast %cst_17 : f32 to vector<1x128xf32>
      %18 = arith.divf %16, %17 : vector<1x128xf32>
      %19 = vector.broadcast %18 : vector<1x128xf32> to vector<8x128xf32>
      %20 = arith.subf %12, %19 : vector<8x128xf32>
      %21 = arith.mulf %20, %20 : vector<8x128xf32>
      %cst_18 = arith.constant dense<0.000000e+00> : vector<128xf32>
      %22 = vector.multi_reduction <add>, %21, %cst_18 [0] : vector<8x128xf32> to vector<128xf32>
      %23 = vector.shape_cast %22 : vector<128xf32> to vector<1x128xf32>
      %cst_19 = arith.constant 8.000000e+00 : f32
      %24 = vector.broadcast %cst_19 : f32 to vector<1x128xf32>
      %25 = arith.divf %23, %24 : vector<1x128xf32>
      %cst_20 = arith.constant 9.99999974E-6 : f32
      %26 = vector.broadcast %cst_20 : f32 to vector<1x128xf32>
      %27 = arith.addf %25, %26 : vector<1x128xf32>
      %28 = math.rsqrt %27 : vector<1x128xf32>
      %29 = arith.mulf %13, %28 : vector<1x128xf32>
      %30 = arith.mulf %18, %29 : vector<1x128xf32>
      %31 = arith.subf %14, %30 : vector<1x128xf32>
      %32 = vector.broadcast %29 : vector<1x128xf32> to vector<8x128xf32>
      %33 = arith.mulf %12, %32 : vector<8x128xf32>
      %34 = vector.broadcast %31 : vector<1x128xf32> to vector<8x128xf32>
      %35 = arith.addf %33, %34 : vector<8x128xf32>
      %36 = arith.negf %35 : vector<8x128xf32>
      %37 = math.exp %36 : vector<8x128xf32>
      %cst_21 = arith.constant 1.000000e+00 : f32
      %38 = vector.broadcast %cst_21 : f32 to vector<8x128xf32>
      %39 = arith.addf %38, %37 : vector<8x128xf32>
      %40 = arith.divf %38, %39 : vector<8x128xf32>
      %41 = arith.mulf %35, %40 : vector<8x128xf32>
      %c0_22 = arith.constant 0 : index
      %c0_23 = arith.constant 0 : index
      %42 = vector.load %arg6[%c0_22, %c0_23] : memref<8x128xf32, #tpu.memory_space<vmem>>, vector<8x128xf32>
      tpu.vector_store %arg6[%c0_22, %c0_23], %41 {strides = array<i32>} : memref<8x128xf32, #tpu.memory_space<vmem>>, vector<8x128xf32>,
    } else {
    }
    return
  }
  func.func @transform_0(%arg0: i32, %arg1: i32) -> (i32, i32) {
    %c0_i32 = arith.constant 0 : i32
    %c0_i32_0 = arith.constant 0 : i32
    return %c0_i32, %arg1 : i32, i32
  }
  func.func @transform_1(%arg0: i32, %arg1: i32) -> (i32, i32) {
    %c0_i32 = arith.constant 0 : i32
    return %arg0, %arg1 : i32, i32
  }
  func.func @transform_2(%arg0: i32, %arg1: i32) -> (i32, i32) {
    %c0_i32 = arith.constant 0 : i32
    %c0_i32_0 = arith.constant 0 : i32
    return %c0_i32, %arg0 : i32, i32
  }
  func.func @transform_3(%arg0: i32, %arg1: i32) -> (i32, i32) {
    %c0_i32 = arith.constant 0 : i32
    %c0_i32_0 = arith.constant 0 : i32
    return %c0_i32, %arg0 : i32, i32
  }
  func.func @transform_4(%arg0: i32, %arg1: i32) -> (i32, i32) {
    %c0_i32 = arith.constant 0 : i32
    %c0_i32_0 = arith.constant 0 : i32
    return %c0_i32, %arg0 : i32, i32
  }
}

</mosaic_0001>

<bundles_post_ra>
// kernel: fc_block.1
= control target key start
LH: loop header
LB: loop body
LE: loop exit
PB: predicated region body
PF: predicated region fallthrough
CT: control target
= control target key end

     0   :  { %v261_v1 = vmov 0.0   ;;  %vm262_vm0 = vmmov 0   ;;  %s349_s0 = inlined_call_operand.vmem [shape: f32[8,128], index: 0, kind: input, shape index: {}]   ;;  %s350_s1 = inlined_call_operand.vmem [shape: f32[128,128], index: 1, kind: input, shape index: {}]   ;;  %s351_s2 = inlined_call_operand.vmem [shape: f32[1,128], index: 2, kind: input, shape index: {}]   ;;  %s352_s3 = inlined_call_operand.vmem [shape: f32[1,128], index: 3, kind: input, shape index: {}]   ;;  %s353_s4 = inlined_call_operand.hbm [shape: f32[8,128], index: 4, kind: output, shape index: {}]  }
   0x1   :  { %v40_v0 = vld [vmem:[%s350_s1 + $0x78] sm:$0xff]  ;;  %195 = vmatprep.subr.mxu0 %v261_v1  ;;  %227 = vmatprep.mubr.msk.f32.mxu0 %vm262_vm0, %v261_v1  ;;  %v39_v2 = vld [vmem:[%s350_s1 + $0x70] sm:$0xff] }
   0x2   :  { %196 = vmatpush3.xpose.msra.mxu0 %v40_v0 }
   0x3   :  { %197 = vmatprep.subr.mxu0 %v261_v1 }
   0x4   :  { %9 = vsyncpa [#allocation4], 0  ;;  %v38_v3 = vld [vmem:[%s350_s1 + $0x68] sm:$0xff]  ;;  %v37_v4 = vld [vmem:[%s350_s1 + $0x60] sm:$0xff]  ;;  %v142_v37 = vlaneseq  ;;  %s263_s25 = smov [#allocation3]  }
   0x5   :  { %v36_v5 = vld [vmem:[%s350_s1 + $0x58] sm:$0xff]  ;;  %v35_v6 = vld [vmem:[%s350_s1 + $0x50] sm:$0xff]  ;;  %v34_v7 = vld [vmem:[%s350_s1 + $0x48] sm:$0xff] }
   0x6   :  { %198 = vmatpush3.xpose.msra.mxu0 %v39_v2  ;;  %v33_v8 = vld [vmem:[%s350_s1 + $0x40] sm:$0xff]  ;;  %v32_v9 = vld [vmem:[%s350_s1 + $0x38] sm:$0xff]  ;;  %v31_v10 = vld [vmem:[%s350_s1 + $0x30] sm:$0xff]  ;;  %v143_v38 = vshrl.u32 %v142_v37, 7 }
   0x7   :  { %199 = vmatprep.subr.mxu0 %v261_v1  ;;  %v30_v11 = vld [vmem:[%s350_s1 + $0x28] sm:$0xff]  ;;  %v29_v12 = vld [vmem:[%s350_s1 + $0x20] sm:$0xff]  ;;  %v28_v13 = vld [vmem:[%s350_s1 + $0x18] sm:$0xff] }
   0x8   :  { %v27_v14 = vld [vmem:[%s350_s1 + $0x10] sm:$0xff]  ;;  %v26_v15 = vld [vmem:[%s350_s1 + $0x8] sm:$0xff]  ;;  %v25_v16 = vld [vmem:[%s350_s1] sm:$0xff]  ;;  %v144_v40 = vsub.s32 0, %v143_v38 }
   0x9   :  { %v24_v17 = vld [vmem:[%s349_s0] sm:$0xff] }
   0xa   :  { %200 = vmatpush3.xpose.msra.mxu0 %v38_v3  ;;  %v117_v39 = vld [vmem:[%s351_s2] sm:$0x1]  ;;  %s169_s2 = sshll.u32 %s263_s25, 4  ;;  %s170_s2 = int_to_ptr.vmem [resolvable:$true] %s169_s2 }
   0xb   :  { %201 = vmatprep.subr.mxu0 %v261_v1  ;;  %v118_v43 = vld [vmem:[%s352_s3] sm:$0x1]  ;;  %s239_s26 = scalar_lea.vmem %s170_s2, 128  ;;  %p244_p1 = scmp.lt.s32.totalorder %s170_s2, %s170_s2 }
   0xc   :  { %p240_p0 = scmp.ne.s32.totalorder %s170_s2, %s239_s26  ;;  %p245_p2 = scmp.lt.s32.totalorder %s239_s26, %s239_s26 }
   0xe   :  { %202 = vmatpush3.xpose.msra.mxu0 %v37_v4  ;;  %p246_p3 = por %p245_p2, %p244_p1 }
   0xf   :  { %203 = vmatprep.subr.mxu0 %v261_v1 }
  0x10   :  { %p247_p4 = pnand %p246_p3, %p240_p0 }
  0x12   :  { %204 = vmatpush3.xpose.msra.mxu0 %v36_v5 }
  0x13   :  { %205 = vmatprep.subr.mxu0 %v261_v1 }
  0x16   :  { %206 = vmatpush3.xpose.msra.mxu0 %v35_v6 }
  0x17   :  { %207 = vmatprep.subr.mxu0 %v261_v1 }
  0x1a   :  { %208 = vmatpush3.xpose.msra.mxu0 %v34_v7 }
  0x1b   :  { %209 = vmatprep.subr.mxu0 %v261_v1 }
  0x1e   :  { %210 = vmatpush3.xpose.msra.mxu0 %v33_v8 }
  0x1f   :  { %211 = vmatprep.subr.mxu0 %v261_v1 }
  0x22   :  { %212 = vmatpush3.xpose.msra.mxu0 %v32_v9 }
  0x23   :  { %213 = vmatprep.subr.mxu0 %v261_v1 }
  0x26   :  { %214 = vmatpush3.xpose.msra.mxu0 %v31_v10 }
  0x27   :  { %215 = vmatprep.subr.mxu0 %v261_v1 }
  0x2a   :  { %216 = vmatpush3.xpose.msra.mxu0 %v30_v11 }
  0x2b   :  { %217 = vmatprep.subr.mxu0 %v261_v1 }
  0x2e   :  { %218 = vmatpush3.xpose.msra.mxu0 %v29_v12 }
  0x2f   :  { %219 = vmatprep.subr.mxu0 %v261_v1 }
  0x32   :  { %220 = vmatpush3.xpose.msra.mxu0 %v28_v13 }
  0x33   :  { %221 = vmatprep.subr.mxu0 %v261_v1 }
  0x36   :  { %222 = vmatpush3.xpose.msra.mxu0 %v27_v14 }
  0x37   :  { %223 = vmatprep.subr.mxu0 %v261_v1 }
  0x3a   :  { %224 = vmatpush3.xpose.msra.mxu0 %v26_v15 }
  0x3b   :  { %225 = vmatprep.subr.mxu0 %v261_v1 }
  0x3e   :  { %226 = vmatpush3.xpose.msra.mxu0 %v25_v16 }
  0x41   :  { %228 = vmatmul.mubr.f32.vlgmr.msra.gmra.mxu0 %v24_v17 }
 0x101   :  { %v107_v18 = vpop.f32.mrf.mxu0 }
 0x102   :  { %v119_v19 = vrot.slane %v107_v18, 4 }
 0x103   :  { %v229_v20 = vpop.f32.mrf.mxu0 }
 0x104   :  { %v120_v21 = vadd.f32 %v119_v19, %v107_v18 }
 0x106   :  { %v121_v22 = vrot.slane %v120_v21, 2 }
 0x108   :  { %v122_v23 = vadd.f32 %v121_v22, %v120_v21 }
 0x10a   :  { %v123_v24 = vrot.slane %v122_v23, 1 }
 0x10c   :  { %v124_v25 = vadd.f32 %v123_v24, %v122_v23 }
 0x10e   :  { %v126_v26 = vmul.f32 0.125, %v124_v25 }
 0x110   :  { %v127_v27 = vsub.f32 %v107_v18, %v126_v26 }
 0x112   :  { %v128_v28 = vmul.f32 %v127_v27, %v127_v27 }
 0x114   :  { %v129_v29 = vrot.slane %v128_v28, 4 }
 0x116   :  { %v130_v30 = vadd.f32 %v129_v29, %v128_v28 }
 0x118   :  { %v131_v31 = vrot.slane %v130_v30, 2 }
 0x11a   :  { %v132_v32 = vadd.f32 %v131_v31, %v130_v30 }
 0x11c   :  { %v133_v33 = vrot.slane %v132_v32, 1 }
 0x11e   :  { %v134_v34 = vadd.f32 %v133_v33, %v132_v32 }
 0x120   :  { %v135_v35 = vmul.f32 0.125, %v134_v34 }
 0x122   :  { %v136_v36 = vadd.f32 1e-05, %v135_v35 }
 0x124   :  { %233 = vrsqrt.f32 %v136_v36 }
 0x131   :  { %v234_v41 = vpop.eup %233 }
 0x132   :  { %v138_v42 = vmul.f32 %v234_v41, %v117_v39 }
 0x134   :  { %v139_v44 = vmul.f32 %v138_v42, %v126_v26  ;;  %v145_v45 = vrot.slane %v138_v42, %v144_v40 }
 0x136   :  { %v140_v46 = vsub.f32 %v118_v43, %v139_v44  ;;  %v147_v47 = vmul.f32 %v145_v45, %v107_v18 }
 0x138   :  { %v152_v48 = vrot.slane %v140_v46, %v144_v40 }
 0x13a   :  { %v154_v49 = vadd.f32 %v152_v48, %v147_v47 }
 0x13c   :  { %v177_v50 = vmul.f32 -1.442695, %v154_v49 }
 0x13e   :  { %235 = vpow2.f32 %v177_v50 }
 0x14b   :  { %v236_v51 = vpop.eup %235 }
 0x14c   :  { %v158_v52 = vadd.f32 1.0, %v236_v51 }
 0x14e   :  { %237 = vrcp.f32 %v158_v52 }
 0x15b   :  { %v238_v53 = vpop.eup %237 }
 0x15c   :  { %v161_v54 = vmul.f32 %v238_v53, %v154_v49 }
 0x15e   :  { %162 = vst [vmem:[#allocation3] sm:$0xff] %v161_v54 }
 0x15f   :  { %250 = shalt.err (!%p247_p4)
}
 0x160   :  { %172 = dma.vmem_to_hbm [thread:$0]  %s170_s2, 128, %s353_s4, [#allocation4]  }
 0x161   :  { %259 = dma.done.wait [#allocation4], 128  }
 0x162   :  { %260 = vsyncadd [#allocation4], 4294967168 }
 0x163   :  { %176 = vsyncpa [#allocation4], 1 }

</bundles_post_ra>
